<compile_context>
chip_gen: v6e
topology: v6e:2x2x1
jax: 0.10.0
libtpu: 0.0.40
codegen_flags: <defaults>
</compile_context>

<pallas_src>
import functools

import jax
import jax.numpy as jnp
from jax import lax
from jax.experimental import pallas as pl
from jax.experimental.pallas import tpu as pltpu

# ----- shapes implied by the module (fc1 in = 64*16*16 forces 64ch, 32x32, N=2) -----
N = 2                     # input batch
CIN = 64                  # conv1 in-channels
COUT = 32                 # conv1 out-channels
H = W = 32                # spatial size
KH = KW = 3
HW = H * W                # 1024 (lane axis per sample)
PH, PW = H // 2, W // 2
PHW = PH * PW             # 256
FC_IN = 64 * 16 * 16      # 16384 (= batch_size*16*16 in the PyTorch module)
FC_HID = 32
FC_OUT = 1
FLAT_ROWS = (N * COUT * PHW) // FC_IN   # 1: both samples fill one flattened FC row
assert FLAT_ROWS == 1 and N * COUT * PHW == FC_IN


# ---------------- roll-semantics probe (lazy, cached, tiny) ----------------
def _roll_probe_kernel(x_ref, o_ref):
    o_ref[...] = pltpu.roll(x_ref[...], 1, axis=1)


@functools.lru_cache(maxsize=None)
def _roll_like_jnp():
    """True iff pltpu.roll matches jnp.roll (data moves toward higher indices)."""
    x = lax.broadcasted_iota(jnp.int32, (8, 128), 1)

    def call(interp):
        return pl.pallas_call(
            _roll_probe_kernel,
            out_shape=jax.ShapeDtypeStruct((8, 128), jnp.int32),
            interpret=interp)(x)

    try:
        r = call(False)          # authoritative: probes the real Mosaic lowering
    except Exception:            # e.g. no TPU attached -> interpreter fallback
        r = call(True)
    first = int(r[0, 0])
    assert first in (127, 1), f"unexpected pltpu.roll semantics: r[0,0]={first}"
    return first == 127


def _shift_up(a, k):
    """Cyclic lane shift: returns b with b[..., g] = a[..., (g + k) % n]."""
    n = a.shape[-1]
    amount = (-k) % n if _roll_like_jnp() else k % n
    return pltpu.roll(a, amount, axis=a.ndim - 1)


# ---------------- the fused kernel ----------------
def fused_kernel(x_ref, wc_ref, bc_ref, w1_ref, b1_ref, w2_ref, b2_ref,
                 o_ref, pflat_ref):
    # x_ref    : (N, CIN, HW)     per-sample activation slabs, lane p = h*W + w
    # wc_ref   : (COUT, 9*CIN)    fused conv taps, col = tap*CIN + cin, tap=(dy+1)*3+(dx+1)
    # bc_ref   : (COUT, 1)        conv bias
    # w1_ref   : (FC_IN, FC_HID)  fc1 weight, native layout (no host-side transpose)
    # b1_ref   : (1, FC_HID)   w2_ref: (1, FC_HID)   b2_ref: (1, FC_OUT)
    # o_ref    : (1, FC_OUT)
    # pflat_ref: (1, FC_IN)       VMEM scratch: flattened pooled activations (fc1 input)

    # Boundary masks for the 3x3 taps, per sample: (1, HW).  HW and W are powers of 2.
    pos = lax.broadcasted_iota(jnp.int32, (1, HW), 1)
    wcol = jnp.bitwise_and(pos, W - 1)
    m_up = (pos >= W).astype(jnp.float32)          # reading row h-1 is valid
    m_dn = (pos < HW - W).astype(jnp.float32)      # reading row h+1 is valid
    m_lt = (wcol >= 1).astype(jnp.float32)         # reading col w-1 is valid
    m_rt = (wcol < W - 1).astype(jnp.float32)      # reading col w+1 is valid

    # 0/1 pool-selection matrix built in-kernel (replaces a 1 MB HBM operand):
    # column q keeps conv position p_sel = 2*W*(q // PW) + 2*(q % PW).
    rowp = lax.broadcasted_iota(jnp.int32, (HW, PHW), 0)
    colq = lax.broadcasted_iota(jnp.int32, (HW, PHW), 1)
    p_sel = ((colq >> 4) << 6) + ((colq & (PW - 1)) << 1)      # PW=16, 2*W=64
    sel = (rowp == p_sel).astype(jnp.float32)                  # (HW, PHW)

    wc = wc_ref[...]
    bc = bc_ref[...]

    for n in range(N):                              # N=2, unrolled at trace time
        xs = x_ref[n]                               # (CIN, HW)

        # conv1 as ONE deep-K MXU matmul: stack 9 shifted+masked taps on sublanes.
        taps = []
        for dy in (-1, 0, 1):
            for dx in (-1, 0, 1):
                off = dy * W + dx
                shifted = xs if off == 0 else _shift_up(xs, off)
                mask = None
                if dy == -1:
                    mask = m_up
                elif dy == 1:
                    mask = m_dn
                if dx == -1:
                    mask = m_lt if mask is None else mask * m_lt
                elif dx == 1:
                    mask = m_rt if mask is None else mask * m_rt
                if mask is not None:
                    shifted = shifted * mask
                taps.append(shifted)
        slab = jnp.concatenate(taps, axis=0)                          # (9*CIN, HW)
        y = jnp.dot(wc, slab, preferred_element_type=jnp.float32) + bc
        y = jnp.maximum(y, 0.0)                                       # relu(conv1)

        # 2x2 maxpool: neighbour maxima via lane rolls, then exact 0/1 selection matmul.
        # Rolls wrap cyclically, but sel only keeps even rows/cols (h,w <= 30), whose
        # +1 / +W neighbours never cross a row or sample edge, so the wrap is benign.
        m1 = jnp.maximum(y, _shift_up(y, 1))
        m2 = jnp.maximum(m1, _shift_up(m1, W))
        pooled = jnp.dot(m2, sel, preferred_element_type=jnp.float32)  # (COUT, PHW)

        # Scatter pooled rows into the flattened fc1 input, matching PyTorch's
        # view(-1, 64*16*16) order: flat = (n*COUT + c)*PHW + q.  64 aligned,
        # unmasked 256-lane stores (PHW is a multiple of 128).
        for c in range(COUT):
            base = (n * COUT + c) * PHW
            pflat_ref[0:1, pl.ds(base, PHW)] = pooled[c:c + 1, :]

    # dropout(p=0.4): identity at inference time.
    # fc1 on the MXU: one (1, 16384) @ (16384, 32) contraction, w1 in native layout.
    h = jnp.dot(pflat_ref[...], w1_ref[...], preferred_element_type=jnp.float32)
    h = jnp.maximum(h + b1_ref[...], 0.0)                              # (1, FC_HID)

    # fc2 + relu (32 MACs: a lane multiply + lane reduce is cheaper than an MXU push)
    o = jnp.sum(h * w2_ref[...], axis=1, keepdims=True)                # (1, FC_OUT)
    o_ref[...] = jnp.maximum(o + b2_ref[...], 0.0)


# ---------------- one-time parameter re-layout (off the per-call path) ----------------
def prepare_params(conv_w, conv_b, w1, b1, w2, b2):
    _roll_like_jnp()   # resolve pltpu.roll semantics once, before tracing the kernel
    # wc[o, tap*CIN + i] = conv_w[o, i, ky, kx] with tap = ky*3 + kx
    wc = jnp.transpose(conv_w, (0, 2, 3, 1)).reshape(COUT, KH * KW * CIN)   # (32, 576)
    bc = conv_b.reshape(COUT, 1)
    w1k = w1.reshape(FC_IN, FC_HID)              # native layout, no transpose needed
    b1k = b1.reshape(1, FC_HID)
    w2k = w2.reshape(FC_OUT, FC_HID)             # valid because FC_OUT == 1
    b2k = b2.reshape(1, FC_OUT)
    return wc, bc, w1k, b1k, w2k, b2k


# ---------------- jitted forward: no relayouts, just the fused pallas_call ----------------
@jax.jit
def age_predictor_forward(x, wc, bc, w1k, b1k, w2k, b2k):
    xk = x.reshape(N, CIN, HW)   # free reshape (merges minor dims); no transpose of x
    return pl.pallas_call(
        fused_kernel,
        out_shape=jax.ShapeDtypeStruct((FLAT_ROWS, FC_OUT), jnp.float32),
        scratch_shapes=[pltpu.VMEM((FLAT_ROWS, FC_IN), jnp.float32)],
        cost_estimate=pl.CostEstimate(flops=110_000_000, transcendentals=0,
                                      bytes_accessed=2_750_000),
        compiler_params=pltpu.CompilerParams(vmem_limit_bytes=40 * 1024 * 1024),
    )(xk, wc, bc, w1k, b1k, w2k, b2k)


# ---------------- pure-JAX reference (for correctness check) ----------------
def reference_forward(x, conv_w, conv_b, w1, b1, w2, b2):
    y = lax.conv_general_dilated(
        x, conv_w, window_strides=(1, 1), padding=((1, 1), (1, 1)),
        dimension_numbers=("NCHW", "OIHW", "NCHW"))
    y = jnp.maximum(y + conv_b[None, :, None, None], 0.0)
    p = lax.reduce_window(y, -jnp.inf, lax.max, (1, 1, 2, 2), (1, 1, 2, 2), "VALID")
    f = p.reshape(-1, FC_IN)
    h = jnp.maximum(jnp.dot(f, w1, precision=lax.Precision.HIGHEST) + b1, 0.0)
    return jnp.maximum(jnp.dot(h, w2, precision=lax.Precision.HIGHEST) + b2, 0.0)


if __name__ == "__main__":
    key = jax.random.PRNGKey(0)
    ks = jax.random.split(key, 7)
    conv_w = jax.random.normal(ks[0], (COUT, CIN, KH, KW), jnp.float32) / (CIN * KH * KW) ** 0.5
    conv_b = jax.random.normal(ks[1], (COUT,), jnp.float32) * 0.01
    w1 = jax.random.normal(ks[2], (FC_IN, FC_HID), jnp.float32) / FC_IN ** 0.5
    b1 = jax.random.normal(ks[3], (FC_HID,), jnp.float32) * 0.01
    w2 = jax.random.normal(ks[4], (FC_HID, FC_OUT), jnp.float32) / FC_HID ** 0.5
    b2 = jax.random.normal(ks[5], (FC_OUT,), jnp.float32) * 0.01
    x = jax.random.normal(ks[6], (N, CIN, H, W), jnp.float32)

    params = prepare_params(conv_w, conv_b, w1, b1, w2, b2)   # one-time re-layout
    out = jax.block_until_ready(age_predictor_forward(x, *params))
    ref = jax.block_until_ready(reference_forward(x, conv_w, conv_b, w1, b1, w2, b2))

    assert out.shape == (FLAT_ROWS, FC_OUT), out.shape
    # f32 end-to-end: tolerance only absorbs MXU f32 pass/summation-order differences.
    assert jnp.allclose(out, ref, rtol=1e-3, atol=1e-3), (out, ref)
    print("KERNEL_OK")
</pallas_src>

<mosaic_0001>
module attributes {stable_mosaic.version = 11 : i64} {
  func.func @_roll_probe_kernel(%arg0: memref<8x128xi32, #tpu.memory_space<vmem>>, %arg1: memref<8x128xi32, #tpu.memory_space<vmem>>) attributes {dimension_semantics = [], scalar_prefetch = 0 : i64, scratch_operands = 0 : i64, tpu.core_type = #tpu.core_type<tc>} {
    %c0 = arith.constant 0 : index
    %c0_0 = arith.constant 0 : index
    %0 = vector.load %arg0[%c0, %c0_0] : memref<8x128xi32, #tpu.memory_space<vmem>>, vector<8x128xi32>
    %c1_i32 = arith.constant 1 : i32
    %1 = tpu.dynamic_rotate %0 by %c1_i32 dim 1 : vector<8x128xi32>, i32 -> vector<8x128xi32>
    %c0_1 = arith.constant 0 : index
    %c0_2 = arith.constant 0 : index
    %2 = vector.load %arg1[%c0_1, %c0_2] : memref<8x128xi32, #tpu.memory_space<vmem>>, vector<8x128xi32>
    tpu.vector_store %arg1[%c0_1, %c0_2], %1 {strides = array<i32>} : memref<8x128xi32, #tpu.memory_space<vmem>>, vector<8x128xi32>,
    return
  }
}

</mosaic_0001>

<bundles_post_ra>
// kernel: tpu_custom_call.1
= control target key start
LH: loop header
LB: loop body
LE: loop exit
PB: predicated region body
PF: predicated region fallthrough
CT: control target
= control target key end

     0   :  { %6 = vsyncpa [#allocation3], 0  ;;  %s106_s0 = inlined_call_operand.hbm [shape: s32[8,128], index: 0, kind: input, shape index: {}]   ;;  %s107_s1 = inlined_call_operand.hbm [shape: s32[8,128], index: 1, kind: output, shape index: {}]  }
   0x1   :  { %7 = vsyncpa [#allocation4], 0  ;;  %s87_s6 = smov [#allocation2]  }
   0x2   :  { %s14_s7 = sshll.u32 %s87_s6, 4  ;;  %s15_s7 = int_to_ptr.vmem [resolvable:$true] %s14_s7 }
   0x3   :  { %s51_s8 = scalar_lea.vmem %s15_s7, 128  ;;  %p56_p1 = scmp.lt.s32.totalorder %s15_s7, %s15_s7 }
   0x4   :  { %p52_p0 = scmp.ne.s32.totalorder %s15_s7, %s51_s8  ;;  %p57_p2 = scmp.lt.s32.totalorder %s51_s8, %s51_s8 }
   0x6   :  { %p58_p3 = por %p57_p2, %p56_p1 }
   0x8   :  { %p59_p4 = pnand %p58_p3, %p52_p0 }
   0xa   :  { %62 = shalt.err (!%p59_p4)
}
   0xb   :  { %17 = dma.hbm_to_vmem [thread:$0]  %s106_s0, 128, %s15_s7, [#allocation3]  }
   0xc   :  { %83 = dma.done.wait [#allocation3], 128  }
   0xd   :  { %84 = vsyncadd [#allocation3], 4294967168  ;;  %v21_v0 = vld [vmem:[#allocation2] sm:$0xff]  ;;  %s88_s11 = smov 1   ;;  %s89_s12 = smov [#allocation5]  }
   0xe   :  { %22 = vrot.lane.b32.xlu0 %v21_v0, %s88_s11  ;;  %s31_s13 = sshll.u32 %s89_s12, 4  ;;  %s32_s13 = int_to_ptr.vmem [resolvable:$true] %s31_s13 }
   0xf   :  { %s63_s14 = scalar_lea.vmem %s32_s13, 128  ;;  %p68_p6 = scmp.lt.s32.totalorder %s32_s13, %s32_s13 }
  0x10   :  { %p64_p5 = scmp.ne.s32.totalorder %s32_s13, %s63_s14  ;;  %p69_p7 = scmp.lt.s32.totalorder %s63_s14, %s63_s14 }
  0x12   :  { %p70_p8 = por %p69_p7, %p68_p6 }
  0x14   :  { %p71_p9 = pnand %p70_p8, %p64_p5 }
  0x80   :  { %v23_v1 = vpop.permute.xlu0 %22 }
  0x81   :  { %24 = vst [vmem:[#allocation5] sm:$0xff] %v23_v1 }
  0x82   :  { %74 = shalt.err (!%p71_p9)
}
  0x83   :  { %34 = dma.vmem_to_hbm [thread:$0]  %s32_s13, 128, %s107_s1, [#allocation4]  }
  0x84   :  { %85 = dma.done.wait [#allocation4], 128  }
  0x85   :  { %86 = vsyncadd [#allocation4], 4294967168 }
  0x86   :  { %38 = vsyncpa [#allocation3], 1 }
  0x87   :  { %39 = vsyncpa [#allocation4], 1 }

</bundles_post_ra>
